<compile_context>
chip_gen: v7x
topology: tpu7x:2x2x1
jax: 0.10.0
libtpu: 0.0.40
codegen_flags: <defaults>
</compile_context>

<pallas_src>
import math
from functools import partial

import jax
import jax.numpy as jnp
import numpy as np
from jax.experimental import pallas as pl
from jax.experimental.pallas import tpu as pltpu

_LANE = 128
_SUBLANE = 8


def _round_up(x, m):
    return (x + m - 1) // m * m


# --------------------------- packed parameter layout -------------------------
def build_layout(state_dim, action_dim, hidden_dim, t_dim):
    """Row layout of the packed (R, 128) f32 parameter array.

    Every sub-tensor starts at an 8-aligned row and is stored (in, out) so the
    kernel computes y = x @ W + b.  tw1 is pre-split into sin/cos row blocks
    and w1 into [x|state] / t_emb row blocks so the in-kernel concats are
    replaced by split-weight partial matmuls on aligned static slices.
    """
    half = t_dim // 2
    xs_dim = action_dim + state_dim
    entries = [
        ("freqs", 1, half),
        ("tw1s", half, 2 * t_dim),          # rows of tw1 hit by sin(emb)
        ("tw1c", half, 2 * t_dim),          # rows of tw1 hit by cos(emb)
        ("tb1", 1, 2 * t_dim),
        ("tw2", 2 * t_dim, t_dim),
        ("tb2", 1, t_dim),
        ("w1xs", xs_dim, hidden_dim),       # rows of w1 hit by [x | state]
        ("w1t", t_dim, hidden_dim),         # rows of w1 hit by t_emb
        ("b1", 1, hidden_dim),
        ("w2", hidden_dim, hidden_dim),
        ("b2", 1, hidden_dim),
        ("w3", hidden_dim, hidden_dim),
        ("b3", 1, hidden_dim),
        ("wf", hidden_dim, action_dim),
        ("bf", 1, action_dim),
    ]
    layout, off = {}, 0
    for name, rows, cols in entries:
        assert cols <= _LANE, "feature dims must fit one 128-lane tile"
        layout[name] = (off, rows, cols)
        off += _round_up(rows, _SUBLANE)
    return layout, _round_up(off, _SUBLANE)


def pack_params(params, layout, total_rows, state_dim, action_dim, t_dim):
    half = t_dim // 2
    xs_dim = action_dim + state_dim
    pieces = {
        "freqs": params["freqs"],
        "tw1s": params["tw1"][:half],
        "tw1c": params["tw1"][half:],
        "tb1": params["tb1"],
        "tw2": params["tw2"],
        "tb2": params["tb2"],
        "w1xs": params["w1"][:xs_dim],
        "w1t": params["w1"][xs_dim:],
        "b1": params["b1"],
        "w2": params["w2"],
        "b2": params["b2"],
        "w3": params["w3"],
        "b3": params["b3"],
        "wf": params["wf"],
        "bf": params["bf"],
    }
    packed = np.zeros((total_rows, _LANE), np.float32)
    for name, arr in pieces.items():
        off, rows, cols = layout[name]
        packed[off:off + rows, :cols] = np.asarray(arr, np.float32).reshape(rows, cols)
    return jnp.asarray(packed)


# ----------------------------- Pallas kernel --------------------------------
def _make_kernel(layout, xs_dim):
    def pslice(p_ref, name, full_lanes=False):
        off, rows, cols = layout[name]
        if full_lanes:
            return p_ref[off:off + rows, :]          # all 128 (zero-padded) lanes
        return p_ref[off:off + rows, :cols]          # static, sublane-aligned slice

    def mish(v):
        # mish(v) = v * tanh(softplus(v)) = v * n / (n + 2), n = e^v (e^v + 2).
        # 1 exp + 1 approx reciprocal (both EUP) instead of exp + log1p + tanh.
        # Clamp at 20: for v >= 20, mish(v) == v to f32 precision and exp()
        # cannot overflow to inf.
        e = jnp.exp(jnp.minimum(v, 20.0))
        n = e * (e + 2.0)
        return v * n * pl.reciprocal(n + 2.0, approx=True)

    def dot(a, b):
        return jnp.dot(a, b, preferred_element_type=jnp.float32)

    def kernel(in_ref, p_ref, out_ref):
        P = partial(pslice, p_ref)

        inp = in_ref[...]                            # (TB, xs_dim + 1)
        xs = inp[:, :xs_dim]                         # (TB, action_dim + state_dim)
        t = inp[:, xs_dim:xs_dim + 1]                # (TB, 1) timestep column

        # Sinusoidal timestep embedding; sin/cos halves kept separate and the
        # concat folded into the split tw1 matmuls below.
        emb = t * P("freqs")                         # (TB, t_dim // 2)
        se, ce = jnp.sin(emb), jnp.cos(emb)

        # time_mlp: Linear(t_dim, 2 t_dim) -> Mish -> Linear(2 t_dim, t_dim)
        h = mish(dot(se, P("tw1s")) + dot(ce, P("tw1c")) + P("tb1"))
        t_emb = dot(h, P("tw2")) + P("tb2")          # (TB, t_dim)

        # mid layers on concat([x, state, t_emb]); the concat is replaced by
        # split-weight partial matmuls accumulated in f32.
        z = mish(dot(xs, P("w1xs")) + dot(t_emb, P("w1t")) + P("b1"))
        z = mish(dot(z, P("w2")) + P("b2"))
        z = mish(dot(z, P("w3")) + P("b3"))

        # Final layer, lane-dense: use all 128 zero-padded output columns so
        # the store is an unmasked full-lane vst; wrapper slices [:action_dim].
        out_ref[...] = (dot(z, P("wf", full_lanes=True))
                        + P("bf", full_lanes=True)).astype(out_ref.dtype)

    return kernel


# ------------------------------ cost estimate --------------------------------
def _cost_estimate(batch, state_dim, action_dim, hidden_dim, t_dim, packed_bytes):
    half = t_dim // 2
    xs_dim = action_dim + state_dim
    flops = 2 * batch * (
        2 * half * 2 * t_dim                                  # sin/cos partial matmuls
        + 2 * t_dim * t_dim                                   # time-mlp second linear
        + (xs_dim + t_dim) * hidden_dim                       # first mid layer (split)
        + 2 * hidden_dim * hidden_dim                         # mid layers 2 & 3
        + hidden_dim * _LANE)                                 # final layer (lane-dense)
    transcendentals = batch * (2 * half + 2 * (2 * t_dim + 3 * hidden_dim))
    io_bytes = int(packed_bytes) + 4 * batch * (xs_dim + 1 + _LANE)
    return pl.CostEstimate(flops=int(flops), transcendentals=int(transcendentals),
                           bytes_accessed=int(io_bytes))


# ------------------------------ JAX wrapper ----------------------------------
def mlp_forward(x, time, state, packed, layout, *, action_dim, block_b=512):
    """x: (B, action_dim) f32, time: (B,) f32, state: (B, state_dim) f32."""
    B = x.shape[0]
    state_dim = state.shape[1]
    xs_dim = action_dim + state_dim
    din = xs_dim + 1
    hidden_dim = layout["w2"][2]
    t_dim = layout["tw2"][2]

    # Batch tile: as large as block_b (multiple of 8) to amortize per-step
    # overhead, but capped at ceil(B/2) so the grid has >= 2 "parallel" steps
    # whenever the batch allows (both v7x TensorCores get work).
    TB = max(_SUBLANE, min(block_b, _round_up((B + 1) // 2, _SUBLANE)))
    B_pad = _round_up(B, TB)

    # One fused batch input: [x | state | time] -> one DMA per grid step.
    fused = jnp.concatenate(
        [x.astype(jnp.float32),
         state.astype(jnp.float32),
         time.reshape(B, 1).astype(jnp.float32)], axis=1)
    if B_pad != B:
        fused = jnp.pad(fused, ((0, B_pad - B), (0, 0)))

    kernel = _make_kernel(layout, xs_dim)

    packed_bytes = packed.size * packed.dtype.itemsize
    ce = _cost_estimate(B_pad, state_dim, action_dim, hidden_dim, t_dim, packed_bytes)

    out = pl.pallas_call(
        kernel,
        out_shape=jax.ShapeDtypeStruct((B_pad, _LANE), jnp.float32),
        grid_spec=pltpu.PrefetchScalarGridSpec(
            num_scalar_prefetch=0,
            grid=(B_pad // TB,),
            in_specs=[
                pl.BlockSpec((TB, din), lambda i: (i, 0)),      # fused [x|state|t]
                # Packed params: constant block index -> fetched once, resident.
                pl.BlockSpec(packed.shape, lambda i: (0, 0)),
            ],
            out_specs=pl.BlockSpec((TB, _LANE), lambda i: (i, 0)),
        ),
        compiler_params=pltpu.CompilerParams(dimension_semantics=("parallel",)),
        cost_estimate=ce,
    )(fused, packed)
    return out[:B, :action_dim]


# --------------------------- parameter initialization ------------------------
def xavier_uniform(key, fan_in, fan_out):
    bound = math.sqrt(6.0 / (fan_in + fan_out))
    # stored as (in, out) so the kernel does x @ W
    return jax.random.uniform(key, (fan_in, fan_out), jnp.float32, -bound, bound)


def init_params(key, state_dim, action_dim, hidden_dim, t_dim=16):
    half_dim = t_dim // 2
    scale = math.log(10000.0) / (half_dim - 1)
    freqs = jnp.exp(jnp.arange(half_dim, dtype=jnp.float32) * -scale).reshape(1, half_dim)

    input_dim = state_dim + action_dim + t_dim
    ks = jax.random.split(key, 6)
    return {
        "freqs": freqs,
        "tw1": xavier_uniform(ks[0], t_dim, 2 * t_dim),
        "tb1": jnp.zeros((1, 2 * t_dim), jnp.float32),
        "tw2": xavier_uniform(ks[1], 2 * t_dim, t_dim),
        "tb2": jnp.zeros((1, t_dim), jnp.float32),
        "w1": xavier_uniform(ks[2], input_dim, hidden_dim),
        "b1": jnp.zeros((1, hidden_dim), jnp.float32),
        "w2": xavier_uniform(ks[3], hidden_dim, hidden_dim),
        "b2": jnp.zeros((1, hidden_dim), jnp.float32),
        "w3": xavier_uniform(ks[4], hidden_dim, hidden_dim),
        "b3": jnp.zeros((1, hidden_dim), jnp.float32),
        "wf": xavier_uniform(ks[5], hidden_dim, action_dim),
        "bf": jnp.zeros((1, action_dim), jnp.float32),
    }


# ------------------------------ pure-JAX reference ---------------------------
def mlp_reference(x, time, state, params):
    def mish(v):
        return v * jnp.tanh(jnp.log1p(jnp.exp(v)))

    emb = time[:, None] * params["freqs"]
    emb = jnp.concatenate([jnp.sin(emb), jnp.cos(emb)], axis=-1)
    h = mish(emb @ params["tw1"] + params["tb1"])
    t_emb = h @ params["tw2"] + params["tb2"]
    z = jnp.concatenate([x, state, t_emb], axis=-1)
    z = mish(z @ params["w1"] + params["b1"])
    z = mish(z @ params["w2"] + params["b2"])
    z = mish(z @ params["w3"] + params["b3"])
    return z @ params["wf"] + params["bf"]


def _check(B, seed, params, packed, layout, action_dim, state_dim):
    kx, ks, kt = jax.random.split(jax.random.PRNGKey(seed), 3)
    x = jax.random.normal(kx, (B, action_dim), jnp.float32)
    state = jax.random.normal(ks, (B, state_dim), jnp.float32)
    t = jax.random.uniform(kt, (B,), jnp.float32, 0.0, 100.0)
    out = jax.block_until_ready(
        mlp_forward(x, t, state, packed, layout, action_dim=action_dim))
    ref = mlp_reference(x, t, state, params)
    # Tolerance slightly loosened because the fused mish uses the EUP's
    # hardware approximate reciprocal (pl.reciprocal(..., approx=True)).
    np.testing.assert_allclose(np.asarray(out), np.asarray(ref), rtol=5e-3, atol=5e-3)


if __name__ == "__main__":
    state_dim, action_dim, hidden_dim, t_dim = 11, 3, 32, 16

    key = jax.random.PRNGKey(0)
    params = init_params(key, state_dim, action_dim, hidden_dim, t_dim)
    layout, total_rows = build_layout(state_dim, action_dim, hidden_dim, t_dim)
    packed = pack_params(params, layout, total_rows, state_dim, action_dim, t_dim)

    # Small batch (single grid step), moderate batch (padding + 2-step grid),
    # and a batch large enough to exercise the full 512-row tiles.
    _check(8, 0, params, packed, layout, action_dim, state_dim)
    _check(200, 1, params, packed, layout, action_dim, state_dim)
    _check(1024, 2, params, packed, layout, action_dim, state_dim)

    print("KERNEL_OK")
</pallas_src>

<mosaic_0001>
module attributes {stable_mosaic.version = 11 : i64} {
  func.func @kernel(%arg0: i32, %arg1: memref<8x15xf32, #tpu.memory_space<vmem>>, %arg2: memref<232x128xf32, #tpu.memory_space<vmem>>, %arg3: memref<8x128xf32, #tpu.memory_space<vmem>>) attributes {dimension_semantics = [#tpu.dimension_semantics<parallel>], iteration_bounds = array<i64: 1>, scalar_prefetch = 0 : i64, scratch_operands = 0 : i64, tpu.core_type = #tpu.core_type<tc>, window_params = [{transform_indices = @transform_0, window_bounds = array<i64: 8, 15>}, {pipeline_mode = #tpu.pipeline_mode<synchronous>, transform_indices = @transform_1, window_bounds = array<i64: 232, 128>}, {transform_indices = @transform_2, window_bounds = array<i64: 8, 128>}]} {
    %c0 = arith.constant 0 : index
    %c0_0 = arith.constant 0 : index
    %0 = vector.load %arg1[%c0, %c0_0] : memref<8x15xf32, #tpu.memory_space<vmem>>, vector<8x15xf32>
    %1 = vector.extract_strided_slice %0 {offsets = [0, 0], sizes = [8, 14], strides = [1, 1]} : vector<8x15xf32> to vector<8x14xf32>
    %2 = vector.extract_strided_slice %0 {offsets = [0, 14], sizes = [8, 1], strides = [1, 1]} : vector<8x15xf32> to vector<8x1xf32>
    %c0_1 = arith.constant 0 : index
    %c0_2 = arith.constant 0 : index
    %3 = vector.load %arg2[%c0_1, %c0_2] : memref<232x128xf32, #tpu.memory_space<vmem>>, vector<1x8xf32>
    %4 = vector.broadcast %2 : vector<8x1xf32> to vector<8x8xf32>
    %5 = vector.broadcast %3 : vector<1x8xf32> to vector<8x8xf32>
    %6 = arith.mulf %4, %5 : vector<8x8xf32>
    %7 = math.sin %6 : vector<8x8xf32>
    %8 = math.cos %6 : vector<8x8xf32>
    %c8 = arith.constant 8 : index
    %c0_3 = arith.constant 0 : index
    %9 = vector.load %arg2[%c8, %c0_3] : memref<232x128xf32, #tpu.memory_space<vmem>>, vector<8x32xf32>
    %cst = arith.constant dense<0.000000e+00> : vector<8x32xf32>
    %10 = tpu.matmul %7, %9, %cst {dimension_numbers = #tpu.dot_dimension_numbers<[1], [0], [0], [1], [0, 0, 1, 1], [], []>} : vector<8x8xf32>, vector<8x32xf32>, vector<8x32xf32> -> vector<8x32xf32>
    %c16 = arith.constant 16 : index
    %c0_4 = arith.constant 0 : index
    %11 = vector.load %arg2[%c16, %c0_4] : memref<232x128xf32, #tpu.memory_space<vmem>>, vector<8x32xf32>
    %cst_5 = arith.constant dense<0.000000e+00> : vector<8x32xf32>
    %12 = tpu.matmul %8, %11, %cst_5 {dimension_numbers = #tpu.dot_dimension_numbers<[1], [0], [0], [1], [0, 0, 1, 1], [], []>} : vector<8x8xf32>, vector<8x32xf32>, vector<8x32xf32> -> vector<8x32xf32>
    %13 = arith.addf %10, %12 : vector<8x32xf32>
    %c24 = arith.constant 24 : index
    %c0_6 = arith.constant 0 : index
    %14 = vector.load %arg2[%c24, %c0_6] : memref<232x128xf32, #tpu.memory_space<vmem>>, vector<1x32xf32>
    %15 = vector.broadcast %14 : vector<1x32xf32> to vector<8x32xf32>
    %16 = arith.addf %13, %15 : vector<8x32xf32>
    %cst_7 = arith.constant 2.000000e+01 : f32
    %17 = vector.broadcast %cst_7 : f32 to vector<8x32xf32>
    %18 = arith.minimumf %16, %17 : vector<8x32xf32>
    %19 = math.exp %18 : vector<8x32xf32>
    %cst_8 = arith.constant 2.000000e+00 : f32
    %20 = vector.broadcast %cst_8 : f32 to vector<8x32xf32>
    %21 = arith.addf %19, %20 : vector<8x32xf32>
    %22 = arith.mulf %19, %21 : vector<8x32xf32>
    %23 = arith.mulf %16, %22 : vector<8x32xf32>
    %cst_9 = arith.constant 2.000000e+00 : f32
    %24 = vector.broadcast %cst_9 : f32 to vector<8x32xf32>
    %25 = arith.addf %22, %24 : vector<8x32xf32>
    %26 = tpu.reciprocal %25 {approx = true} : vector<8x32xf32> -> vector<8x32xf32>
    %27 = arith.mulf %23, %26 : vector<8x32xf32>
    %c32 = arith.constant 32 : index
    %c0_10 = arith.constant 0 : index
    %28 = vector.load %arg2[%c32, %c0_10] : memref<232x128xf32, #tpu.memory_space<vmem>>, vector<32x16xf32>
    %cst_11 = arith.constant dense<0.000000e+00> : vector<8x16xf32>
    %29 = tpu.matmul %27, %28, %cst_11 {dimension_numbers = #tpu.dot_dimension_numbers<[1], [0], [0], [1], [0, 0, 1, 1], [], []>} : vector<8x32xf32>, vector<32x16xf32>, vector<8x16xf32> -> vector<8x16xf32>
    %c64 = arith.constant 64 : index
    %c0_12 = arith.constant 0 : index
    %30 = vector.load %arg2[%c64, %c0_12] : memref<232x128xf32, #tpu.memory_space<vmem>>, vector<1x16xf32>
    %31 = vector.broadcast %30 : vector<1x16xf32> to vector<8x16xf32>
    %32 = arith.addf %29, %31 : vector<8x16xf32>
    %c72 = arith.constant 72 : index
    %c0_13 = arith.constant 0 : index
    %33 = vector.load %arg2[%c72, %c0_13] : memref<232x128xf32, #tpu.memory_space<vmem>>, vector<14x32xf32>
    %cst_14 = arith.constant dense<0.000000e+00> : vector<8x32xf32>
    %34 = tpu.matmul %1, %33, %cst_14 {dimension_numbers = #tpu.dot_dimension_numbers<[1], [0], [0], [1], [0, 0, 1, 1], [], []>} : vector<8x14xf32>, vector<14x32xf32>, vector<8x32xf32> -> vector<8x32xf32>
    %c88 = arith.constant 88 : index
    %c0_15 = arith.constant 0 : index
    %35 = vector.load %arg2[%c88, %c0_15] : memref<232x128xf32, #tpu.memory_space<vmem>>, vector<16x32xf32>
    %cst_16 = arith.constant dense<0.000000e+00> : vector<8x32xf32>
    %36 = tpu.matmul %32, %35, %cst_16 {dimension_numbers = #tpu.dot_dimension_numbers<[1], [0], [0], [1], [0, 0, 1, 1], [], []>} : vector<8x16xf32>, vector<16x32xf32>, vector<8x32xf32> -> vector<8x32xf32>
    %37 = arith.addf %34, %36 : vector<8x32xf32>
    %c104 = arith.constant 104 : index
    %c0_17 = arith.constant 0 : index
    %38 = vector.load %arg2[%c104, %c0_17] : memref<232x128xf32, #tpu.memory_space<vmem>>, vector<1x32xf32>
    %39 = vector.broadcast %38 : vector<1x32xf32> to vector<8x32xf32>
    %40 = arith.addf %37, %39 : vector<8x32xf32>
    %cst_18 = arith.constant 2.000000e+01 : f32
    %41 = vector.broadcast %cst_18 : f32 to vector<8x32xf32>
    %42 = arith.minimumf %40, %41 : vector<8x32xf32>
    %43 = math.exp %42 : vector<8x32xf32>
    %cst_19 = arith.constant 2.000000e+00 : f32
    %44 = vector.broadcast %cst_19 : f32 to vector<8x32xf32>
    %45 = arith.addf %43, %44 : vector<8x32xf32>
    %46 = arith.mulf %43, %45 : vector<8x32xf32>
    %47 = arith.mulf %40, %46 : vector<8x32xf32>
    %cst_20 = arith.constant 2.000000e+00 : f32
    %48 = vector.broadcast %cst_20 : f32 to vector<8x32xf32>
    %49 = arith.addf %46, %48 : vector<8x32xf32>
    %50 = tpu.reciprocal %49 {approx = true} : vector<8x32xf32> -> vector<8x32xf32>
    %51 = arith.mulf %47, %50 : vector<8x32xf32>
    %c112 = arith.constant 112 : index
    %c0_21 = arith.constant 0 : index
    %52 = vector.load %arg2[%c112, %c0_21] : memref<232x128xf32, #tpu.memory_space<vmem>>, vector<32x32xf32>
    %cst_22 = arith.constant dense<0.000000e+00> : vector<8x32xf32>
    %53 = tpu.matmul %51, %52, %cst_22 {dimension_numbers = #tpu.dot_dimension_numbers<[1], [0], [0], [1], [0, 0, 1, 1], [], []>} : vector<8x32xf32>, vector<32x32xf32>, vector<8x32xf32> -> vector<8x32xf32>
    %c144 = arith.constant 144 : index
    %c0_23 = arith.constant 0 : index
    %54 = vector.load %arg2[%c144, %c0_23] : memref<232x128xf32, #tpu.memory_space<vmem>>, vector<1x32xf32>
    %55 = vector.broadcast %54 : vector<1x32xf32> to vector<8x32xf32>
    %56 = arith.addf %53, %55 : vector<8x32xf32>
    %cst_24 = arith.constant 2.000000e+01 : f32
    %57 = vector.broadcast %cst_24 : f32 to vector<8x32xf32>
    %58 = arith.minimumf %56, %57 : vector<8x32xf32>
    %59 = math.exp %58 : vector<8x32xf32>
    %cst_25 = arith.constant 2.000000e+00 : f32
    %60 = vector.broadcast %cst_25 : f32 to vector<8x32xf32>
    %61 = arith.addf %59, %60 : vector<8x32xf32>
    %62 = arith.mulf %59, %61 : vector<8x32xf32>
    %63 = arith.mulf %56, %62 : vector<8x32xf32>
    %cst_26 = arith.constant 2.000000e+00 : f32
    %64 = vector.broadcast %cst_26 : f32 to vector<8x32xf32>
    %65 = arith.addf %62, %64 : vector<8x32xf32>
    %66 = tpu.reciprocal %65 {approx = true} : vector<8x32xf32> -> vector<8x32xf32>
    %67 = arith.mulf %63, %66 : vector<8x32xf32>
    %c152 = arith.constant 152 : index
    %c0_27 = arith.constant 0 : index
    %68 = vector.load %arg2[%c152, %c0_27] : memref<232x128xf32, #tpu.memory_space<vmem>>, vector<32x32xf32>
    %cst_28 = arith.constant dense<0.000000e+00> : vector<8x32xf32>
    %69 = tpu.matmul %67, %68, %cst_28 {dimension_numbers = #tpu.dot_dimension_numbers<[1], [0], [0], [1], [0, 0, 1, 1], [], []>} : vector<8x32xf32>, vector<32x32xf32>, vector<8x32xf32> -> vector<8x32xf32>
    %c184 = arith.constant 184 : index
    %c0_29 = arith.constant 0 : index
    %70 = vector.load %arg2[%c184, %c0_29] : memref<232x128xf32, #tpu.memory_space<vmem>>, vector<1x32xf32>
    %71 = vector.broadcast %70 : vector<1x32xf32> to vector<8x32xf32>
    %72 = arith.addf %69, %71 : vector<8x32xf32>
    %cst_30 = arith.constant 2.000000e+01 : f32
    %73 = vector.broadcast %cst_30 : f32 to vector<8x32xf32>
    %74 = arith.minimumf %72, %73 : vector<8x32xf32>
    %75 = math.exp %74 : vector<8x32xf32>
    %cst_31 = arith.constant 2.000000e+00 : f32
    %76 = vector.broadcast %cst_31 : f32 to vector<8x32xf32>
    %77 = arith.addf %75, %76 : vector<8x32xf32>
    %78 = arith.mulf %75, %77 : vector<8x32xf32>
    %79 = arith.mulf %72, %78 : vector<8x32xf32>
    %cst_32 = arith.constant 2.000000e+00 : f32
    %80 = vector.broadcast %cst_32 : f32 to vector<8x32xf32>
    %81 = arith.addf %78, %80 : vector<8x32xf32>
    %82 = tpu.reciprocal %81 {approx = true} : vector<8x32xf32> -> vector<8x32xf32>
    %83 = arith.mulf %79, %82 : vector<8x32xf32>
    %c192 = arith.constant 192 : index
    %c0_33 = arith.constant 0 : index
    %84 = vector.load %arg2[%c192, %c0_33] : memref<232x128xf32, #tpu.memory_space<vmem>>, vector<32x128xf32>
    %cst_34 = arith.constant dense<0.000000e+00> : vector<8x128xf32>
    %85 = tpu.matmul %83, %84, %cst_34 {dimension_numbers = #tpu.dot_dimension_numbers<[1], [0], [0], [1], [0, 0, 1, 1], [], []>} : vector<8x32xf32>, vector<32x128xf32>, vector<8x128xf32> -> vector<8x128xf32>
    %c224 = arith.constant 224 : index
    %c0_35 = arith.constant 0 : index
    %86 = vector.load %arg2[%c224, %c0_35] : memref<232x128xf32, #tpu.memory_space<vmem>>, vector<1x128xf32>
    %87 = vector.broadcast %86 : vector<1x128xf32> to vector<8x128xf32>
    %88 = arith.addf %85, %87 : vector<8x128xf32>
    %c0_36 = arith.constant 0 : index
    %c0_37 = arith.constant 0 : index
    %89 = vector.load %arg3[%c0_36, %c0_37] : memref<8x128xf32, #tpu.memory_space<vmem>>, vector<8x128xf32>
    tpu.vector_store %arg3[%c0_36, %c0_37], %88 {strides = array<i32>} : memref<8x128xf32, #tpu.memory_space<vmem>>, vector<8x128xf32>,
    return
  }
  func.func @transform_0(%arg0: i32) -> (i32, i32) {
    %c0_i32 = arith.constant 0 : i32
    %c0_i32_0 = arith.constant 0 : i32
    return %arg0, %c0_i32 : i32, i32
  }
  func.func @transform_1(%arg0: i32) -> (i32, i32) {
    %c0_i32 = arith.constant 0 : i32
    %c0_i32_0 = arith.constant 0 : i32
    %c0_i32_1 = arith.constant 0 : i32
    return %c0_i32, %c0_i32_0 : i32, i32
  }
  func.func @transform_2(%arg0: i32) -> (i32, i32) {
    %c0_i32 = arith.constant 0 : i32
    %c0_i32_0 = arith.constant 0 : i32
    return %arg0, %c0_i32 : i32, i32
  }
}

</mosaic_0001>

<bundles_post_ra>
// kernel: tpu_custom_call.1
= control target key start
LH: loop header
LB: loop body
LE: loop exit
PB: predicated region body
PF: predicated region fallthrough
CT: control target
= control target key end

     0   :  { %7 = vsyncpa [#allocation3], 0  ;;  %s1354_s0 = inlined_call_operand.hbm [shape: f32[8,15], index: 0, kind: input, shape index: {}]   ;;  %s1355_s1 = inlined_call_operand.hbm [shape: f32[232,128], index: 1, kind: input, shape index: {}]   ;;  %s1356_s2 = inlined_call_operand.hbm [shape: f32[8,128], index: 2, kind: output, shape index: {}]  }
   0x1   :  { %8 = vsyncpa [#allocation6], 0 }
   0x2   :  { %9 = vsyncpa [#allocation4], 0  ;;  %s1221_s9 = smov [#allocation2]   ;;  %s1222_s11 = smov [#allocation5]  }
   0x3   :  { %s16_s10 = sshll.u32 %s1221_s9, 4  ;;  %s25_s12 = sshll.u32 %s1222_s11, 4  ;;  %s17_s10 = int_to_ptr.vmem [resolvable:$true] %s16_s10  ;;  %s1252_s12 = int_to_ptr.vmem [resolvable:$true] %s25_s12 }
   0x4   :  { %s1149_s15 = scalar_lea.hbm %s1354_s0, 128 }
   0x5   :  { %p1150_p0 = scmp.ne.s32.totalorder %s1354_s0, %s1149_s15  ;;  %p1153_p1 = scmp.lt.u32.totalorder %s1149_s15, %s1354_s0 }
   0x7   :  { %p1155_p2 = pnand %p1153_p1, %p1150_p0 }
   0x9   :  { %1158 = shalt.err (!%p1155_p2)
}
   0xa   :  { %s1159_s20 = scalar_lea.vmem %s17_s10, 128  ;;  %p1164_p4 = scmp.lt.s32.totalorder %s17_s10, %s17_s10 }
   0xb   :  { %p1160_p3 = scmp.ne.s32.totalorder %s17_s10, %s1159_s20  ;;  %p1165_p5 = scmp.lt.s32.totalorder %s1159_s20, %s1159_s20 }
   0xd   :  { %p1166_p6 = por %p1165_p5, %p1164_p4 }
   0xf   :  { %p1167_p7 = pnand %p1166_p6, %p1160_p3 }
  0x11   :  { %1170 = shalt.err (!%p1167_p7)
}
  0x12   :  { %19 = dma.hbm_to_vmem [thread:$0]  %s1354_s0, 128, %s17_s10, [#allocation3]  }
  0x13   :  { %s1171_s25 = scalar_lea.hbm %s1355_s1, 3712 }
  0x14   :  { %p1172_p8 = scmp.ne.s32.totalorder %s1355_s1, %s1171_s25  ;;  %p1175_p9 = scmp.lt.u32.totalorder %s1171_s25, %s1355_s1 }
  0x16   :  { %p1177_p10 = pnand %p1175_p9, %p1172_p8 }
  0x18   :  { %1180 = shalt.err (!%p1177_p10)
}
  0x19   :  { %s1181_s30 = scalar_lea.vmem %s1252_s12, 3712  ;;  %p1186_p12 = scmp.lt.s32.totalorder %s1252_s12, %s1252_s12 }
  0x1a   :  { %p1182_p11 = scmp.ne.s32.totalorder %s1252_s12, %s1181_s30  ;;  %p1187_p13 = scmp.lt.s32.totalorder %s1181_s30, %s1181_s30 }
  0x1c   :  { %p1188_p0 = por %p1187_p13, %p1186_p12 }
  0x1e   :  { %p1189_p1 = pnand %p1188_p0, %p1182_p11 }
  0x20   :  { %1192 = shalt.err (!%p1189_p1)
}
  0x21   :  { %s1223_s0 = smov 128   ;;  %s1224_s3 = smov 8  }
  0x22   :  { %31 = dma.hbm_to_vmem [thread:$0]  %s1355_s1, 3712, %s1252_s12, [#allocation6], %s1223_s0, %s1223_s0, %s1224_s3  }
  0x23   :  { %1215 = dma.done.wait [#allocation3], 128  }
  0x24   :  { %1216 = vsyncadd [#allocation3], 4294967168 }
  0x25   :  { %1217 = dma.done.wait [#allocation6], 3712  }
  0x26   :  { %1218 = vsyncadd [#allocation6], 4294963584  ;;  %v1225_v0 = vmov 14   ;;  %v1283_v1 = vld [vmem:[#allocation2] sm:$0xff]  ;;  %v258_v2 = vld [vmem:[#allocation5 + $0x10] sm:$0xff]  ;;  %v1226_v3 = vmov 0.0  }
  0x27   :  { %1128 = vset.pattern.permute.xlu0 %v1225_v0  ;;  %1009 = vmatprep.subr.mxu1 %v1226_v3  ;;  %vm1227_vm0 = vmmov 0   ;;  %v955_v4 = vld [vmem:[#allocation5] ss:$0 sm:$0xff]  ;;  %v1228_v17 = vmov 683565275   ;;  %vm259_vm11 = vcmask 64512  }
  0x28   :  { %42 = vperm.xlu0 %1128, %v1283_v1   ;;  %1011 = vmatprep.mubr.msk.f32.mxu1 %vm1227_vm0, %v1226_v3  ;;  %v1229_v19 = vmov 2475754826   ;;  %v1230_v22 = vmov 2131351028   ;;  %v1231_v25 = vmov 2102212464  }
  0x29   :  { %1010 = vmatpush3.msra.mxu1 %v258_v2  ;;  %1027 = vmatprep.mubr.msk.f32.mxu0 %vm1227_vm0, %v1226_v3  ;;  %v1232_v28 = vmov 920167782   ;;  %v1233_v31 = vmov 1326507024   ;;  %s1236_s1 = smov [#allocation7]  }
  0x2a   :  { %1014 = vmatprep.subr.mxu1 %v1226_v3  ;;  %s945_s6 = sshll.u32 %s1236_s1, 4  ;;  %s946_s6 = int_to_ptr.vmem [resolvable:$true] %s945_s6 }
  0x2b   :  { %s1193_s7 = scalar_lea.vmem %s946_s6, 128  ;;  %p1198_p3 = scmp.lt.s32.totalorder %s946_s6, %s946_s6 }
  0x2c   :  { %p1194_p2 = scmp.ne.s32.totalorder %s946_s6, %s1193_s7  ;;  %p1199_p4 = scmp.lt.s32.totalorder %s1193_s7, %s1193_s7 }
  0x2e   :  { %p1200_p5 = por %p1199_p4, %p1198_p3 }
  0x30   :  { %p1201_p6 = pnand %p1200_p5, %p1194_p2 }
  0xa7   :  { %v43_v5 = vpop.permute.xlu0 %42 }
  0xa8   :  { %v1292_v6 = vmul.f32 %v955_v4, %v43_v5 }
  0xaa   :  { %v53_v7 = vand.u32 2139095040, %v1292_v6  ;;  %v50_v11 = vand.u32 2147483647, %v1292_v6  ;;  %vm52_vm8 = vcmp.lt.s32.totalorder %v1292_v6, 0 }
  0xac   :  { %v54_v8 = vshrl.u32 %v53_v7, 23  ;;  %v57_v14 = vand.u32 8388607, %v50_v11  ;;  %vm51_vm9 = vcmp.le.f32.partialorder %v50_v11, 0.7853982 }
  0xae   :  { %v956_v9 = vadd.s32 4294967169, %v54_v8  ;;  %v58_v33 = vor.u32 8388608, %v57_v14 }
  0xb0   :  { %v60_v10 = vadd.s32 1, %v956_v9  ;;  %v98_v47 = vshll.u32 %v58_v33, 8 }
  0xb2   :  { %vm61_vm1 = vcmp.gt.s32.totalorder %v60_v10, 0 }
  0xb3   :  { %v62_v12 = vsel %vm61_vm1, %v60_v10, 0  ;;  %vm142_vm1 = vweird.f32 %v1292_v6 }
  0xb4   :  { %v64_v13 = vand.u32 31, %v62_v12  ;;  %v63_v16 = vshrl.u32 %v62_v12, 5 }
  0xb6   :  { %v65_v15 = vsub.s32 32, %v64_v13  ;;  %v67_v18 = vshll.u32 %v1228_v17, %v64_v13  ;;  %v70_v20 = vshll.u32 %v1229_v19, %v64_v13  ;;  %v73_v24 = vshll.u32 %v1230_v22, %v64_v13 }
  0xb7   :  { %v76_v27 = vshll.u32 %v1231_v25, %v64_v13  ;;  %v79_v30 = vshll.u32 %v1232_v28, %v64_v13  ;;  %vm82_vm2 = vcmp.lt.s32.totalorder %v63_v16, 1  ;;  %vm85_vm3 = vcmp.lt.s32.totalorder %v63_v16, 4 }
  0xb8   :  { %v68_v21 = vshrl.u32 %v1229_v19, %v65_v15  ;;  %v71_v23 = vshrl.u32 %v1230_v22, %v65_v15  ;;  %v74_v26 = vshrl.u32 %v1231_v25, %v65_v15  ;;  %v77_v29 = vshrl.u32 %v1232_v28, %v65_v15 }
  0xb9   :  { %v80_v32 = vshrl.u32 %v1233_v31, %v65_v15  ;;  %v66_v42 = vshrl.u32 %v1228_v17, %v65_v15  ;;  %vm84_vm4 = vcmp.lt.s32.totalorder %v63_v16, 3  ;;  %vm83_vm5 = vcmp.lt.s32.totalorder %v63_v16, 2 }
  0xba   :  { %v69_v34 = vor.u32 %v68_v21, %v67_v18  ;;  %v72_v35 = vor.u32 %v71_v23, %v70_v20  ;;  %v75_v36 = vor.u32 %v74_v26, %v73_v24  ;;  %v78_v37 = vor.u32 %v77_v29, %v76_v27 }
  0xbb   :  { %v81_v38 = vor.u32 %v80_v32, %v79_v30 }
  0xbc   :  { %v87_v39 = vsel %vm85_vm3, %v75_v36, 2102212464  ;;  %v90_v40 = vsel %vm82_vm2, %v69_v34, %v72_v35  ;;  %v94_v41 = vsel %vm82_vm2, %v72_v35, %v75_v36  ;;  %v91_v43 = vsel %vm85_vm3, %v78_v37, 920167782 }
  0xbd   :  { %v95_v44 = vsel %vm85_vm3, %v81_v38, 1326507024  ;;  %v92_v45 = vsel %vm84_vm4, %v75_v36, %v91_v43  ;;  %v86_v48 = vsel %vm82_vm2, %v66_v42, %v69_v34  ;;  %v88_v49 = vsel %vm84_vm4, %v72_v35, %v87_v39  ;;  %v257_v39 = vld [vmem:[#allocation5 + $0x8] sm:$0xff]  ;;  %v421_v43 = vld [vmem:[#allocation5 + $0x20] sm:$0xff] }
  0xbe   :  { %v96_v46 = vsel %vm84_vm4, %v78_v37, %v95_v44  ;;  %v93_v50 = vsel %vm83_vm5, %v90_v40, %v92_v45  ;;  %v89_v56 = vsel %vm83_vm5, %v86_v48, %v88_v49  ;;  %v422_v44 = vld [vmem:[#allocation5 + $0x28] sm:$0xff]  ;;  %v1234_v45 = vmov 0.0|0.0   ;;  %v506_v49 = vld [vmem:[#allocation5 + $0x58] sm:$0xff] }
  0xbf   :  { %v97_v51 = vsel %vm83_vm5, %v94_v41, %v96_v46  ;;  %v1301_v54 = vmul.u32.u64.low %v98_v47, %v93_v50  ;;  %v1302_v55 = vmul.u32.u64.high %v98_v47, %v93_v50, %v1301_v54  ;;  %v105_v58 = vmul.u32 %v98_v47, %v89_v56  ;;  %1077 = vmatprep.subr.bf16.mxu0 %v1234_v45  ;;  %v423_v46 = vld [vmem:[#allocation5 + $0x30] sm:$0xff]  ;;  %v507_v50 = vld [vmem:[#allocation5 + $0x60] sm:$0xff] }
  0xc0   :  { %v1298_v52 = vmul.u32.u64.low %v98_v47, %v97_v51  ;;  %v1299_v53 = vmul.u32.u64.high %v98_v47, %v97_v51, %v1298_v52  ;;  %v424_v47 = vld [vmem:[#allocation5 + $0x38] sm:$0xff]  ;;  %v1084_v51 = vpack.c.bf16 %v507_v50, %v506_v49  ;;  %vm430_vm3 = vcmask 261120  }
  0xc1   :  { %v108_v57 = vadd.s32 1, %v1302_v55  ;;  %v1081_v48 = vpack.c.bf16 %v424_v47, %v423_v46  ;;  %vm585_vm4 = vcmask 1045504   ;;  %vm508_vm5 = vcmask 130048  }
  0xc2   :  { %vm107_vm6 = vc.u32 %v1299_v53, %v1301_v54  ;;  %v106_v9 = vadd.s32 %v1301_v54, %v1299_v53 }
  0xc3   :  { %v109_v59 = vsel %vm107_vm6, %v108_v57, %v1302_v55  ;;  %v966_v55 = vld [vmem:[#allocation5 + $0x18] ss:$0 sm:$0xff]  ;;  %vm1235_vm6 = vmmov 1  }
  0xc4   :  { %v110_v60 = vadd.s32 %v109_v59, %v105_v58 }
  0xc6   :  { %v111_v61 = vadd.s32 536870912, %v110_v60 }
  0xc8   :  { %v112_v62 = vshrl.u32 %v111_v61, 30 }
  0xca   :  { %v113_v63 = vshll.u32 %v112_v62, 30  ;;  %v136_v22 = vsub.s32 4, %v112_v62 }
  0xcc   :  { %v114_v0 = vsub.s32 %v110_v60, %v113_v63  ;;  %v137_v26 = vsel %vm52_vm8, %v136_v22, %v112_v62 }
  0xcd   :  { %v139_v27 = vsel %vm51_vm9, 0, %v137_v26 }
  0xce   :  { %v116_v2 = vsub.s32 0, %v114_v0  ;;  %v143_v28 = vadd.s32 3, %v139_v27  ;;  %v247_v29 = vand.u32 3, %v139_v27 }
  0xd0   :  { %v957_v4 = vmin.u32 %v116_v2, %v114_v0  ;;  %v144_v30 = vand.u32 3, %v143_v28  ;;  %vm252_vm10 = vcmp.eq.s32.totalorder %v247_v29, 2  ;;  %vm249_vm14 = vcmp.eq.s32.totalorder %v247_v29, 0 }
  0xd1   :  { %vm248_vm15 = vcmp.lt.s32.totalorder %v247_v29, 2 }
  0xd2   :  { %v118_v5 = vclz %v957_v4  ;;  %vm146_vm12 = vcmp.eq.s32.totalorder %v144_v30, 0  ;;  %vm149_vm13 = vcmp.eq.s32.totalorder %v144_v30, 2  ;;  %vm145_vm2 = vcmp.lt.s32.totalorder %v144_v30, 2 }
  0xd4   :  { %v958_v7 = vadd.s32 4294967294, %v118_v5 }
  0xd6   :  { %vm959_vm7 = vcmp.lt.s32.totalorder %v958_v7, 0 }
  0xd7   :  { %v121_v8 = vsel %vm959_vm7, 0, %v958_v7  ;;  %v504_v7 = vld [vmem:[#allocation5 + $0x48] sm:$0xff]  ;;  %vm1088_vm7 = vmpackc.low %vm585_vm4, %vm1235_vm6 }
  0xd8   :  { %v122_v10 = vsub.s32 32, %v121_v8  ;;  %v126_v12 = vsub.s32 4294967266, %v121_v8  ;;  %v123_v13 = vshll.u32 %v114_v0, %v121_v8  ;;  %v505_v8 = vld [vmem:[#allocation5 + $0x50] sm:$0x3f] }
  0xda   :  { %v124_v14 = vshrl.u32 %v106_v9, %v122_v10  ;;  %v127_v15 = vadd.s32 127, %v126_v12  ;;  %v967_v9 = vld [vmem:[#allocation5 + $0x40] ss:$0 sm:$0xff]  ;;  %v1087_v12 = vpack.c.bf16 %v505_v8, %v504_v7 }
  0xdc   :  { %v125_v16 = vor.u32 %v124_v14, %v123_v13  ;;  %v128_v17 = vshll.u32 %v127_v15, 23  ;;  %v674_v15 = vld [vmem:[#allocation5 + $0x70] sm:$0xff] }
  0xde   :  { %v129_v18 = vor.u32 4788187, %v128_v17  ;;  %v132_v20 = vcvt.s32.f32 %v125_v16  ;;  %v675_v16 = vld [vmem:[#allocation5 + $0x78] sm:$0xff] }
  0xdf   :  { %v1091_v17 = vpack.c.bf16 %v675_v16, %v674_v15 }
  0xe0   :  { %v130_v19 = vand.u32 2147483647, %v129_v18  ;;  %v676_v18 = vld [vmem:[#allocation5 + $0x80] sm:$0xff] }
  0xe2   :  { %v133_v21 = vmul.f32 %v132_v20, %v130_v19  ;;  %v677_v19 = vld [vmem:[#allocation5 + $0x88] sm:$0xff] }
  0xe3   :  { %v1094_v20 = vpack.c.bf16 %v677_v19, %v676_v18 }
  0xe4   :  { %v134_v23 = vxor.u32 2147483648, %v133_v21 }
  0xe6   :  { %v135_v24 = vsel %vm52_vm8, %v134_v23, %v133_v21  ;;  %vm582_vm8 = vcmask 113664  }
  0xe7   :  { %v138_v25 = vsel %vm51_vm9, %v1292_v6, %v135_v24  ;;  %v1078_v6 = vpack.c.bf16 %v422_v44, %v421_v43  ;;  %v972_v24 = vld [vmem:[#allocation5 + $0x68] ss:$0 sm:$0xff] }
  0xe8   :  { %1129 = vcosq.f32 %v138_v25 }
  0xe9   :  { %1131 = vsinq.f32 %v138_v25  ;;  %1079 = vmatpush3.bf16.msra.mxu0 %v1078_v6 }
  0xea   :  { %1080 = vmatprep.subr.bf16.mxu0 %v1234_v45 }
  0xed   :  { %1082 = vmatpush3.bf16.msra.mxu0 %v1081_v48 }
  0xee   :  { %1090 = vmatprep.subr.bf16.mxu0 %v1234_v45 }
  0xf2   :  { %v1130_v31 = vpop.eup %1129 }
  0xf3   :  { %v1132_v32 = vpop.eup %1131  ;;  %v150_v33 = vxor.u32 2147483648, %v1130_v31 }
  0xf4   :  { %v147_v34 = vxor.u32 2147483648, %v1132_v32 }
  0xf5   :  { %v254_v11 = vsel %vm252_vm10, %v150_v33, %v1132_v32  ;;  %v151_v36 = vsel %vm149_vm13, %v150_v33, %v1132_v32 }
  0xf6   :  { %v148_v35 = vsel %vm146_vm12, %v1130_v31, %v147_v34  ;;  %v251_v37 = vsel %vm249_vm14, %v1130_v31, %v147_v34 }
  0xf7   :  { %v255_v38 = vsel %vm248_vm15, %v251_v37, %v254_v11  ;;  %v152_v41 = vsel %vm145_vm2, %v148_v35, %v151_v36  ;;  %v765_v35 = vld [vmem:[#allocation5 + $0x98] sm:$0xff]  ;;  %v766_v36 = vld [vmem:[#allocation5 + $0xa0] sm:$0xff] }
  0xf8   :  { %v256_v40 = vsel %vm142_vm1, nan, %v255_v38  ;;  %v153_v42 = vsel %vm142_vm1, nan, %v152_v41  ;;  %v1097_v37 = vpack.c.bf16 %v766_v36, %v765_v35  ;;  %v767_v38 = vld [vmem:[#allocation5 + $0xa8] sm:$0xff]  ;;  %v973_v41 = vld [vmem:[#allocation5 + $0x90] ss:$0 sm:$0xff] }
  0xf9   :  { %1012 = vmatmul.mubr.msk.f32.vlgmr.msra.gmra.mrb[0].mxu1 %vm259_vm11, %v256_v40 }
  0xfa   :  { %1015 = vmatpush3.msra.mxu1 %v257_v39  ;;  %1016 = vmatprep.mubr.msk.f32.mxu1 %vm1227_vm0, %v1226_v3  ;;  %v768_v39 = vld [vmem:[#allocation5 + $0xb0] sm:$0xff] }
  0xfb   :  { %1083 = vmatprep.subr.bf16.mxu1 %v1234_v45  ;;  %v1100_v40 = vpack.c.bf16 %v768_v39, %v767_v38 }
  0xfd   :  { %1017 = vmatmul.mubr.msk.f32.vlgmr.msra.gmra.mrb[2].mxu1 %vm259_vm11, %v153_v42 }
  0xfe   :  { %1034 = vmatprep.mubr.msk.f32.mxu1 %vm1227_vm0, %v1226_v3  ;;  %1085 = vmatpush3.bf16.msra.mxu1 %v1084_v51 }
  0xff   :  { %1086 = vmatprep.subr.bf16.mxu1 %v1234_v45 }
 0x1cc   :  { %v329_v52 = vpop.f32.mrb[0].mxu1 }
 0x1cd   :  { %v1013_v53 = vpop.f32.mrb[1].mxu1 }
 0x1ce   :  { %v856_v53 = vld [vmem:[#allocation5 + $0xc0] sm:$0xff] }
 0x1d0   :  { %v402_v54 = vpop.f32.mrb[2].mxu1 }
 0x1d1   :  { %v403_v56 = vadd.f32 %v402_v54, %v329_v52  ;;  %v1018_v57 = vpop.f32.mrb[3].mxu1  ;;  %v857_v54 = vld [vmem:[#allocation5 + $0xc8] sm:$0xff] }
 0x1d2   :  { %v859_v57 = vld [vmem:[#allocation5 + $0xd8] sm:$0xff] }
 0x1d3   :  { %v411_v58 = vadd.f32 %v966_v55, %v403_v56  ;;  %v1103_v55 = vpack.c.bf16 %v857_v54, %v856_v53  ;;  %v858_v56 = vld [vmem:[#allocation5 + $0xd0] sm:$0xff] }
 0x1d5   :  { %v412_v59 = vmin.f32 %v411_v58, 20.0 }
 0x1d7   :  { %v413_v60 = vmul.f32 1.442695, %v412_v59  ;;  %v975_v59 = vld [vmem:[#allocation5 + $0xb8] ss:$0 sm:$0xff] }
 0x1d9   :  { %1133 = vpow2.f32 %v413_v60 }
 0x1e3   :  { %v1134_v61 = vpop.eup %1133 }
 0x1e4   :  { %v415_v62 = vadd.f32 2.0, %v1134_v61 }
 0x1e6   :  { %v416_v63 = vmul.f32 %v1134_v61, %v415_v62 }
 0x1e8   :  { %v418_v0 = vadd.f32 2.0, %v416_v63  ;;  %v417_v2 = vmul.f32 %v416_v63, %v411_v58  ;;  %v1106_v58 = vpack.c.bf16 %v859_v57, %v858_v56 }
 0x1ea   :  { %1135 = vrcp.f32 %v418_v0 }
 0x1f4   :  { %v1136_v4 = vpop.eup %1135 }
 0x1f5   :  { %v420_v5 = vmul.f32 %v1136_v4, %v417_v2 }
 0x1f7   :  { %1028 = vmatmul.mubr.msk.f32.vlgmr.msra.gmra.mrb[0].mxu0 %vm430_vm3, %v420_v5 }
 0x1f8   :  { %1052 = vmatprep.mubr.msk.f32.mxu0 %vm1227_vm0, %v1226_v3  ;;  %1092 = vmatpush3.bf16.msra.mxu0 %v1091_v17 }
 0x1f9   :  { %1093 = vmatprep.subr.bf16.mxu0 %v1234_v45 }
 0x1fc   :  { %1095 = vmatpush3.bf16.msra.mxu0 %v1094_v20 }
 0x1fd   :  { %1102 = vmatprep.subr.bf16.mxu0 %v1234_v45 }
 0x2ca   :  { %v500_v10 = vpop.f32.mrb[0].mxu0 }
 0x2cb   :  { %v501_v13 = vadd.f32 %v967_v9, %v500_v10  ;;  %v1029_v14 = vpop.f32.mrb[1].mxu0 }
 0x2cd   :  { %1035 = vmatmul.mubr.msk.f32.vlgmr.msra.gmra.mrb[4].mxu1 %vm508_vm5, %v501_v13 }
 0x2ce   :  { %1089 = vmatpush3.bf16.msk.msra.mxu1 %vm1088_vm7, %v1087_v12  ;;  %1041 = vmatprep.mubr.msk.f32.mxu1 %vm1227_vm0, %v1226_v3 }
 0x2cf   :  { %1096 = vmatprep.subr.bf16.mxu1 %v1234_v45 }
 0x2d1   :  { %1042 = vmatmul.mubr.msk.f32.vlgmr.msra.gmra.mrb[6].mxu1 %vm582_vm8, %v1283_v1 }
 0x2d2   :  { %1063 = vmatprep.mubr.msk.f32.mxu1 %vm1227_vm0, %v1226_v3  ;;  %1098 = vmatpush3.bf16.msra.mxu1 %v1097_v37 }
 0x2d3   :  { %1099 = vmatprep.subr.bf16.mxu1 %v1234_v45 }
 0x2d6   :  { %1101 = vmatpush3.bf16.msra.mxu1 %v1100_v40 }
 0x3a0   :  { %v578_v21 = vpop.f32.mrb[4].mxu1 }
 0x3a1   :  { %v1036_v22 = vpop.f32.mrb[5].mxu1 }
 0x3a4   :  { %v655_v23 = vpop.f32.mrb[6].mxu1 }
 0x3a5   :  { %v656_v1 = vadd.f32 %v655_v23, %v578_v21  ;;  %v1043_v25 = vpop.f32.mrb[7].mxu1 }
 0x3a7   :  { %v664_v26 = vadd.f32 %v972_v24, %v656_v1 }
 0x3a9   :  { %v665_v27 = vmin.f32 %v664_v26, 20.0 }
 0x3ab   :  { %v666_v28 = vmul.f32 1.442695, %v665_v27 }
 0x3ad   :  { %1137 = vpow2.f32 %v666_v28 }
 0x3b7   :  { %v1138_v29 = vpop.eup %1137 }
 0x3b8   :  { %v668_v30 = vadd.f32 2.0, %v1138_v29 }
 0x3ba   :  { %v669_v31 = vmul.f32 %v1138_v29, %v668_v30 }
 0x3bc   :  { %v671_v32 = vadd.f32 2.0, %v669_v31  ;;  %v670_v33 = vmul.f32 %v669_v31, %v664_v26 }
 0x3be   :  { %1139 = vrcp.f32 %v671_v32 }
 0x3c8   :  { %v1140_v34 = vpop.eup %1139 }
 0x3c9   :  { %v673_v11 = vmul.f32 %v1140_v34, %v670_v33 }
 0x3cb   :  { %1053 = vmatmul.mubr.msk.f32.vlgmr.msra.gmra.mrb[2].mxu0 %vm430_vm3, %v673_v11 }
 0x3cc   :  { %1074 = vmatprep.mubr.msk.f32.mxu0 %vm1227_vm0, %v1226_v3  ;;  %1104 = vmatpush3.bf16.msra.mxu0 %v1103_v55 }
 0x3cd   :  { %1105 = vmatprep.subr.bf16.mxu0 %v1234_v45  ;;  %v977_v45 = vld [vmem:[#allocation5 + $0xe0] ss:$0 sm:$0xff] }
 0x3d0   :  { %1107 = vmatpush3.bf16.msra.mxu0 %v1106_v58 }
 0x49e   :  { %v752_v42 = vpop.f32.mrb[2].mxu0 }
 0x49f   :  { %v753_v43 = vadd.f32 %v973_v41, %v752_v42  ;;  %v1054_v44 = vpop.f32.mrb[3].mxu0 }
 0x4a1   :  { %v756_v6 = vmin.f32 %v753_v43, 20.0 }
 0x4a3   :  { %v757_v46 = vmul.f32 1.442695, %v756_v6 }
 0x4a5   :  { %1141 = vpow2.f32 %v757_v46 }
 0x4af   :  { %v1142_v47 = vpop.eup %1141 }
 0x4b0   :  { %v759_v48 = vadd.f32 2.0, %v1142_v47 }
 0x4b2   :  { %v760_v3 = vmul.f32 %v1142_v47, %v759_v48 }
 0x4b4   :  { %v762_v49 = vadd.f32 2.0, %v760_v3  ;;  %v761_v50 = vmul.f32 %v760_v3, %v753_v43 }
 0x4b6   :  { %1143 = vrcp.f32 %v762_v49 }
 0x4c0   :  { %v1144_v51 = vpop.eup %1143 }
 0x4c1   :  { %v764_v52 = vmul.f32 %v1144_v51, %v761_v50 }
 0x4c3   :  { %1064 = vmatmul.mubr.msk.f32.vlgmr.msra.gmra.mrb[8].mxu1 %vm430_vm3, %v764_v52 }
 0x596   :  { %v843_v60 = vpop.f32.mrb[8].mxu1 }
 0x597   :  { %v844_v61 = vadd.f32 %v975_v59, %v843_v60  ;;  %v1065_v62 = vpop.f32.mrb[9].mxu1 }
 0x599   :  { %v847_v63 = vmin.f32 %v844_v61, 20.0 }
 0x59b   :  { %v848_v0 = vmul.f32 1.442695, %v847_v63 }
 0x59d   :  { %1145 = vpow2.f32 %v848_v0 }
 0x5a7   :  { %v1146_v2 = vpop.eup %1145 }
 0x5a8   :  { %v850_v4 = vadd.f32 2.0, %v1146_v2 }
 0x5aa   :  { %v851_v5 = vmul.f32 %v1146_v2, %v850_v4 }
 0x5ac   :  { %v853_v7 = vadd.f32 2.0, %v851_v5  ;;  %v852_v8 = vmul.f32 %v851_v5, %v844_v61 }
 0x5ae   :  { %1147 = vrcp.f32 %v853_v7 }
 0x5b8   :  { %v1148_v9 = vpop.eup %1147 }
 0x5b9   :  { %v855_v10 = vmul.f32 %v1148_v9, %v852_v8 }
 0x5bb   :  { %1075 = vmatmul.mubr.msk.f32.vlgmr.msra.gmra.mrb[4].mxu0 %vm430_vm3, %v855_v10 }
 0x68e   :  { %v934_v12 = vpop.f32.mrb[4].mxu0 }
 0x68f   :  { %v935_v13 = vadd.f32 %v977_v45, %v934_v12  ;;  %v1076_v14 = vpop.f32.mrb[5].mxu0 }
 0x691   :  { %938 = vst [vmem:[#allocation7] sm:$0xff] %v935_v13 }
 0x692   :  { %1204 = shalt.err (!%p1201_p6)
}
 0x693   :  { %s1205_s10 = scalar_lea.hbm %s1356_s2, 128 }
 0x694   :  { %p1206_p7 = scmp.ne.s32.totalorder %s1356_s2, %s1205_s10  ;;  %p1209_p8 = scmp.lt.u32.totalorder %s1205_s10, %s1356_s2 }
 0x696   :  { %p1211_p9 = pnand %p1209_p8, %p1206_p7 }
 0x698   :  { %1214 = shalt.err (!%p1211_p9)
}
 0x699   :  { %948 = dma.vmem_to_hbm [thread:$0]  %s946_s6, 128, %s1356_s2, [#allocation4]  }
 0x69a   :  { %1219 = dma.done.wait [#allocation4], 128  }
 0x69b   :  { %1220 = vsyncadd [#allocation4], 4294967168 }
 0x69c   :  { %952 = vsyncpa [#allocation3], 1 }
 0x69d   :  { %953 = vsyncpa [#allocation6], 1 }
 0x69e   :  { %954 = vsyncpa [#allocation4], 1 }

</bundles_post_ra>
